<compile_context>
chip_gen: v6e
topology: v6e:2x2x1
jax: 0.10.0
libtpu: 0.0.40
codegen_flags: <defaults>
</compile_context>

<pallas_src>
import functools

import jax
import jax.numpy as jnp
from jax.experimental import pallas as pl
from jax.experimental.pallas import tpu as pltpu

D_IN, H1, H2, D_OUT = 28 * 28, 256, 128, 10
D_OUT_PAD = 128   # lane-dense output slab; real logits are columns [:10]


def _round_up(n, m):
    return ((n + m - 1) // m) * m


def _pick_tb(B, batch_tile):
    """Batch tile: single full block for tiny batches, otherwise at least two
    grid steps (v7x has 2 TensorCores) with 16-row granularity."""
    if B <= 16:
        return _round_up(B, 8)            # block == full array, any size OK
    half = _round_up(pl.cdiv(B, 2), 16)   # >= 2 grid steps for mid-size batches
    return min(int(batch_tile), half)


def mlp_kernel(x_ref, w1_ref, b1_ref, w2_ref, b2_ref, w3_ref, b3_ref, o_ref):
    # fc1 + ReLU   (bf16 MXU operands, f32 accumulation; elementwise math in f32)
    x = x_ref[...].astype(jnp.bfloat16)
    h1 = jnp.dot(x, w1_ref[...], preferred_element_type=jnp.float32)
    h1 = jnp.maximum(h1 + b1_ref[...], 0.0)
    # fc2 + LeakyReLU(0.01)
    h2 = jnp.dot(h1.astype(jnp.bfloat16), w2_ref[...],
                 preferred_element_type=jnp.float32)
    h2 = h2 + b2_ref[...]
    h2 = jnp.where(h2 > 0, h2, 0.01 * h2)
    # fc3 (logits, no activation); store bf16 to halve the padded writeback
    out = jnp.dot(h2.astype(jnp.bfloat16), w3_ref[...],
                  preferred_element_type=jnp.float32)
    o_ref[...] = (out + b3_ref[...]).astype(o_ref.dtype)


@functools.partial(jax.jit, static_argnames=("batch_tile",))
def mlp_forward(x, kparams, *, batch_tile=512):
    """x: (B, 1, 28, 28) or (B, 784). kparams: output of prepare_params().
    Returns (B, 10) float32 logits."""
    w1, b1, w2, b2, w3, b3 = kparams
    x2d = x.reshape(-1, D_IN).astype(jnp.float32)   # torch: x.view(-1, 784)
    B = x2d.shape[0]

    tb = _pick_tb(B, batch_tile)
    B_pad = _round_up(B, tb)
    if B_pad != B:
        # Only when B isn't a tile multiple; fuses under jit (zero rows sliced off).
        x2d = jnp.pad(x2d, ((0, B_pad - B), (0, 0)))

    grid = (B_pad // tb,)
    out = pl.pallas_call(
        mlp_kernel,
        out_shape=jax.ShapeDtypeStruct((B_pad, D_OUT_PAD), jnp.bfloat16),
        grid_spec=pl.GridSpec(
            grid=grid,
            in_specs=[
                pl.BlockSpec((tb, D_IN), lambda i: (i, 0)),        # x tile (f32)
                pl.BlockSpec((D_IN, H1), lambda i: (0, 0)),        # w1 (resident bf16)
                pl.BlockSpec((1, H1), lambda i: (0, 0)),           # b1 (f32)
                pl.BlockSpec((H1, H2), lambda i: (0, 0)),          # w2 (bf16)
                pl.BlockSpec((1, H2), lambda i: (0, 0)),           # b2 (f32)
                pl.BlockSpec((H2, D_OUT_PAD), lambda i: (0, 0)),   # w3 (bf16, padded cols)
                pl.BlockSpec((1, D_OUT_PAD), lambda i: (0, 0)),    # b3 (f32, padded cols)
            ],
            out_specs=pl.BlockSpec((tb, D_OUT_PAD), lambda i: (i, 0)),
        ),
        compiler_params=pltpu.CompilerParams(
            dimension_semantics=("parallel",),
            vmem_limit_bytes=24 * 1024 * 1024,
        ),
    )(x2d, w1, b1, w2, b2, w3, b3)

    # Slice off padded rows / lanes and return f32 logits; fuses under jit.
    return out[:B, :D_OUT].astype(jnp.float32)


def init_params(key):
    """Matches torch.nn.Linear default init (uniform +-1/sqrt(fan_in)).
    Weights stored as (in, out) so the kernel computes x @ W + b."""
    def linear(k, fan_in, fan_out):
        kw, kb = jax.random.split(k)
        bound = 1.0 / jnp.sqrt(fan_in)
        w = jax.random.uniform(kw, (fan_in, fan_out), jnp.float32, -bound, bound)
        b = jax.random.uniform(kb, (1, fan_out), jnp.float32, -bound, bound)
        return w, b

    k1, k2, k3 = jax.random.split(key, 3)
    w1, b1 = linear(k1, D_IN, H1)
    w2, b2 = linear(k2, H1, H2)
    w3, b3 = linear(k3, H2, D_OUT)
    return (w1, b1, w2, b2, w3, b3)


def prepare_params(params):
    """One-time conversion of f32 params to the kernel-resident layout:
    bf16 matmul operands, fc3 weight/bias padded to a lane-dense 128-wide slab."""
    w1, b1, w2, b2, w3, b3 = params
    w1_k = w1.astype(jnp.bfloat16)
    w2_k = w2.astype(jnp.bfloat16)
    w3_k = jnp.pad(w3, ((0, 0), (0, D_OUT_PAD - D_OUT))).astype(jnp.bfloat16)
    b3_k = jnp.pad(b3, ((0, 0), (0, D_OUT_PAD - D_OUT)))
    return (w1_k, b1, w2_k, b2, w3_k, b3_k)


def mlp_reference(x, params):
    """Plain-JAX f32 reference matching the PyTorch module."""
    w1, b1, w2, b2, w3, b3 = params
    x2d = x.reshape(-1, D_IN)
    h1 = jnp.maximum(x2d @ w1 + b1, 0.0)
    h2 = h1 @ w2 + b2
    h2 = jnp.where(h2 > 0, h2, 0.01 * h2)
    return h2 @ w3 + b3


if __name__ == "__main__":
    key = jax.random.PRNGKey(0)
    k_param, k_x = jax.random.split(key)

    params = init_params(k_param)
    kparams = prepare_params(params)            # one-time weight preprocessing
    x = jax.random.normal(k_x, (8, 1, 28, 28), dtype=jnp.float32)  # MNIST-like NCHW

    out = jax.block_until_ready(mlp_forward(x, kparams))
    ref = mlp_reference(x, params)

    assert out.shape == (8, D_OUT)
    # bf16 matmul operands / bf16 logit store with f32 accumulation -> relaxed tol.
    assert jnp.allclose(out, ref, atol=5e-2, rtol=5e-2), "mismatch vs reference"

    print("KERNEL_OK")
</pallas_src>

<mosaic_0001>
module attributes {stable_mosaic.version = 11 : i64} {
  func.func @mlp_kernel(%arg0: i32, %arg1: memref<8x784xf32, #tpu.memory_space<vmem>>, %arg2: memref<784x256xbf16, #tpu.memory_space<vmem>>, %arg3: memref<1x256xf32, #tpu.memory_space<vmem>>, %arg4: memref<256x128xbf16, #tpu.memory_space<vmem>>, %arg5: memref<1x128xf32, #tpu.memory_space<vmem>>, %arg6: memref<128x128xbf16, #tpu.memory_space<vmem>>, %arg7: memref<1x128xf32, #tpu.memory_space<vmem>>, %arg8: memref<8x128xbf16, #tpu.memory_space<vmem>>) attributes {dimension_semantics = [#tpu.dimension_semantics<parallel>], iteration_bounds = array<i64: 1>, scalar_prefetch = 0 : i64, scratch_operands = 0 : i64, tpu.core_type = #tpu.core_type<tc>, window_params = [{transform_indices = @transform_0, window_bounds = array<i64: 8, 784>}, {pipeline_mode = #tpu.pipeline_mode<synchronous>, transform_indices = @transform_1, window_bounds = array<i64: 784, 256>}, {pipeline_mode = #tpu.pipeline_mode<synchronous>, transform_indices = @transform_2, window_bounds = array<i64: 1, 256>}, {pipeline_mode = #tpu.pipeline_mode<synchronous>, transform_indices = @transform_3, window_bounds = array<i64: 256, 128>}, {pipeline_mode = #tpu.pipeline_mode<synchronous>, transform_indices = @transform_4, window_bounds = array<i64: 1, 128>}, {pipeline_mode = #tpu.pipeline_mode<synchronous>, transform_indices = @transform_5, window_bounds = array<i64: 128, 128>}, {pipeline_mode = #tpu.pipeline_mode<synchronous>, transform_indices = @transform_6, window_bounds = array<i64: 1, 128>}, {transform_indices = @transform_7, window_bounds = array<i64: 8, 128>}]} {
    %c0 = arith.constant 0 : index
    %c0_0 = arith.constant 0 : index
    %0 = vector.load %arg1[%c0, %c0_0] : memref<8x784xf32, #tpu.memory_space<vmem>>, vector<8x784xf32>
    %1 = arith.truncf %0 : vector<8x784xf32> to vector<8x784xbf16>
    %c0_1 = arith.constant 0 : index
    %c0_2 = arith.constant 0 : index
    %2 = vector.load %arg2[%c0_1, %c0_2] : memref<784x256xbf16, #tpu.memory_space<vmem>>, vector<784x256xbf16>
    %cst = arith.constant dense<0.000000e+00> : vector<8x256xf32>
    %3 = tpu.matmul %1, %2, %cst {dimension_numbers = #tpu.dot_dimension_numbers<[1], [0], [0], [1], [0, 0, 1, 1], [], []>} : vector<8x784xbf16>, vector<784x256xbf16>, vector<8x256xf32> -> vector<8x256xf32>
    %c0_3 = arith.constant 0 : index
    %c0_4 = arith.constant 0 : index
    %4 = vector.load %arg3[%c0_3, %c0_4] : memref<1x256xf32, #tpu.memory_space<vmem>>, vector<1x256xf32>
    %5 = vector.broadcast %4 : vector<1x256xf32> to vector<8x256xf32>
    %6 = arith.addf %3, %5 : vector<8x256xf32>
    %cst_5 = arith.constant 0.000000e+00 : f32
    %7 = vector.broadcast %cst_5 : f32 to vector<8x256xf32>
    %8 = arith.maximumf %6, %7 : vector<8x256xf32>
    %9 = arith.truncf %8 : vector<8x256xf32> to vector<8x256xbf16>
    %c0_6 = arith.constant 0 : index
    %c0_7 = arith.constant 0 : index
    %10 = vector.load %arg4[%c0_6, %c0_7] : memref<256x128xbf16, #tpu.memory_space<vmem>>, vector<256x128xbf16>
    %cst_8 = arith.constant dense<0.000000e+00> : vector<8x128xf32>
    %11 = tpu.matmul %9, %10, %cst_8 {dimension_numbers = #tpu.dot_dimension_numbers<[1], [0], [0], [1], [0, 0, 1, 1], [], []>} : vector<8x256xbf16>, vector<256x128xbf16>, vector<8x128xf32> -> vector<8x128xf32>
    %c0_9 = arith.constant 0 : index
    %c0_10 = arith.constant 0 : index
    %12 = vector.load %arg5[%c0_9, %c0_10] : memref<1x128xf32, #tpu.memory_space<vmem>>, vector<1x128xf32>
    %13 = vector.broadcast %12 : vector<1x128xf32> to vector<8x128xf32>
    %14 = arith.addf %11, %13 : vector<8x128xf32>
    %cst_11 = arith.constant 0.000000e+00 : f32
    %15 = vector.broadcast %cst_11 : f32 to vector<8x128xf32>
    %16 = arith.cmpf ogt, %14, %15 : vector<8x128xf32>
    %cst_12 = arith.constant 0.00999999977 : f32
    %17 = vector.broadcast %cst_12 : f32 to vector<8x128xf32>
    %18 = arith.mulf %17, %14 : vector<8x128xf32>
    %19 = arith.select %16, %14, %18 : vector<8x128xi1>, vector<8x128xf32>
    %20 = arith.truncf %19 : vector<8x128xf32> to vector<8x128xbf16>
    %c0_13 = arith.constant 0 : index
    %c0_14 = arith.constant 0 : index
    %21 = vector.load %arg6[%c0_13, %c0_14] : memref<128x128xbf16, #tpu.memory_space<vmem>>, vector<128x128xbf16>
    %cst_15 = arith.constant dense<0.000000e+00> : vector<8x128xf32>
    %22 = tpu.matmul %20, %21, %cst_15 {dimension_numbers = #tpu.dot_dimension_numbers<[1], [0], [0], [1], [0, 0, 1, 1], [], []>} : vector<8x128xbf16>, vector<128x128xbf16>, vector<8x128xf32> -> vector<8x128xf32>
    %c0_16 = arith.constant 0 : index
    %c0_17 = arith.constant 0 : index
    %23 = vector.load %arg7[%c0_16, %c0_17] : memref<1x128xf32, #tpu.memory_space<vmem>>, vector<1x128xf32>
    %24 = vector.broadcast %23 : vector<1x128xf32> to vector<8x128xf32>
    %25 = arith.addf %22, %24 : vector<8x128xf32>
    %26 = arith.truncf %25 : vector<8x128xf32> to vector<8x128xbf16>
    %c0_18 = arith.constant 0 : index
    %c0_19 = arith.constant 0 : index
    %27 = vector.load %arg8[%c0_18, %c0_19] : memref<8x128xbf16, #tpu.memory_space<vmem>>, vector<8x128xbf16>
    tpu.vector_store %arg8[%c0_18, %c0_19], %26 {strides = array<i32>} : memref<8x128xbf16, #tpu.memory_space<vmem>>, vector<8x128xbf16>,
    return
  }
  func.func @transform_0(%arg0: i32) -> (i32, i32) {
    %c0_i32 = arith.constant 0 : i32
    %c0_i32_0 = arith.constant 0 : i32
    return %arg0, %c0_i32 : i32, i32
  }
  func.func @transform_1(%arg0: i32) -> (i32, i32) {
    %c0_i32 = arith.constant 0 : i32
    %c0_i32_0 = arith.constant 0 : i32
    %c0_i32_1 = arith.constant 0 : i32
    return %c0_i32, %c0_i32_0 : i32, i32
  }
  func.func @transform_2(%arg0: i32) -> (i32, i32) {
    %c0_i32 = arith.constant 0 : i32
    %c0_i32_0 = arith.constant 0 : i32
    %c0_i32_1 = arith.constant 0 : i32
    return %c0_i32, %c0_i32_0 : i32, i32
  }
  func.func @transform_3(%arg0: i32) -> (i32, i32) {
    %c0_i32 = arith.constant 0 : i32
    %c0_i32_0 = arith.constant 0 : i32
    %c0_i32_1 = arith.constant 0 : i32
    return %c0_i32, %c0_i32_0 : i32, i32
  }
  func.func @transform_4(%arg0: i32) -> (i32, i32) {
    %c0_i32 = arith.constant 0 : i32
    %c0_i32_0 = arith.constant 0 : i32
    %c0_i32_1 = arith.constant 0 : i32
    return %c0_i32, %c0_i32_0 : i32, i32
  }
  func.func @transform_5(%arg0: i32) -> (i32, i32) {
    %c0_i32 = arith.constant 0 : i32
    %c0_i32_0 = arith.constant 0 : i32
    %c0_i32_1 = arith.constant 0 : i32
    return %c0_i32, %c0_i32_0 : i32, i32
  }
  func.func @transform_6(%arg0: i32) -> (i32, i32) {
    %c0_i32 = arith.constant 0 : i32
    %c0_i32_0 = arith.constant 0 : i32
    %c0_i32_1 = arith.constant 0 : i32
    return %c0_i32, %c0_i32_0 : i32, i32
  }
  func.func @transform_7(%arg0: i32) -> (i32, i32) {
    %c0_i32 = arith.constant 0 : i32
    %c0_i32_0 = arith.constant 0 : i32
    return %arg0, %c0_i32 : i32, i32
  }
}

</mosaic_0001>

<bundles_post_ra>
// kernel: mlp_forward.1
= control target key start
LH: loop header
LB: loop body
LE: loop exit
PB: predicated region body
PF: predicated region fallthrough
CT: control target
= control target key end

     0   :  { %12 = vsyncpa [#allocation3], 0  ;;  %s1927_s0 = inlined_call_operand.vmem [shape: f32[8,784], index: 0, kind: input, shape index: {}]   ;;  %s1928_s1 = inlined_call_operand.vmem [shape: bf16[784,256], index: 1, kind: input, shape index: {}]   ;;  %s1929_s2 = inlined_call_operand.vmem [shape: f32[1,256], index: 2, kind: input, shape index: {}]   ;;  %s1930_s3 = inlined_call_operand.hbm [shape: bf16[256,128], index: 3, kind: input, shape index: {}]   ;;  %s1931_s4 = inlined_call_operand.vmem [shape: f32[1,128], index: 4, kind: input, shape index: {}]   ;;  %s1932_s5 = inlined_call_operand.hbm [shape: bf16[128,128], index: 5, kind: input, shape index: {}]   ;;  %s1933_s6 = inlined_call_operand.vmem [shape: f32[1,128], index: 6, kind: input, shape index: {}]   ;;  %s1934_s7 = inlined_call_operand.vmem [shape: bf16[8,128], index: 7, kind: output, shape index: {}]  }
   0x1   :  { %13 = vsyncpa [#allocation5], 0  ;;  %s1537_s24 = smov [#allocation2]  }
   0x2   :  { %s25_s25 = sshll.u32 %s1537_s24, 4  ;;  %s26_s25 = int_to_ptr.vmem [resolvable:$true] %s25_s25 }
   0x3   :  { %s1501_s26 = scalar_lea.vmem %s26_s25, 2048  ;;  %p1506_p1 = scmp.lt.s32.totalorder %s26_s25, %s26_s25 }
   0x4   :  { %p1502_p0 = scmp.ne.s32.totalorder %s26_s25, %s1501_s26  ;;  %p1507_p2 = scmp.lt.s32.totalorder %s1501_s26, %s1501_s26 }
   0x6   :  { %p1508_p3 = por %p1507_p2, %p1506_p1 }
   0x8   :  { %p1509_p4 = pnand %p1508_p3, %p1502_p0 }
   0xa   :  { %1512 = shalt.err (!%p1509_p4)
}
   0xb   :  { %s1538_s27 = smov 64   ;;  %s1539_s28 = smov 4  }
   0xc   :  { %31 = dma.hbm_to_vmem [thread:$0]  %s1930_s3, 2048, %s26_s25, [#allocation3], %s1538_s27, %s1538_s27, %s1539_s28  }
   0xd   :  { %s1540_s8 = smov [#allocation4]  }
   0xe   :  { %s39_s9 = sshll.u32 %s1540_s8, 4  ;;  %s40_s9 = int_to_ptr.vmem [resolvable:$true] %s39_s9 }
   0xf   :  { %s1521_s10 = scalar_lea.vmem %s40_s9, 1024  ;;  %p1526_p6 = scmp.lt.s32.totalorder %s40_s9, %s40_s9 }
  0x10   :  { %p1522_p5 = scmp.ne.s32.totalorder %s40_s9, %s1521_s10  ;;  %p1527_p7 = scmp.lt.s32.totalorder %s1521_s10, %s1521_s10 }
  0x12   :  { %p1528_p8 = por %p1527_p7, %p1526_p6 }
  0x14   :  { %p1529_p9 = pnand %p1528_p8, %p1522_p5 }
  0x16   :  { %1532 = shalt.err (!%p1529_p9)
}
  0x17   :  { %45 = dma.hbm_to_vmem [thread:$0]  %s1932_s5, 1024, %s40_s9, [#allocation5], %s1538_s27, %s1538_s27, %s1539_s28  }
  0x18   :  { %1533 = dma.done.wait [#allocation3], 2048  }
  0x19   :  { %1534 = vsyncadd [#allocation3], 4294965248 }
  0x1a   :  { %1535 = dma.done.wait [#allocation5], 1024  }
  0x1b   :  { %1536 = vsyncadd [#allocation5], 4294966272  ;;  %v1322_v0 = vld [vmem:[%s1928_s1 + $0x74] ss:$8 sps:$4 sm:$0xff]   ;;  %v1324_v1 = vld [vmem:[%s1928_s1 + $0x70] ss:$8 sps:$4 sm:$0xff]  }
  0x1c   :  { %673 = vmatprep.subr.bf16.mxu0 %v1322_v0  ;;  %v1325_v2 = vld [vmem:[%s1928_s1 + $0x174] ss:$8 sps:$4 sm:$0xff]   ;;  %v1327_v3 = vld [vmem:[%s1928_s1 + $0x170] ss:$8 sps:$4 sm:$0xff]   ;;  %v1328_v4 = vld [vmem:[%s1928_s1 + $0x64] ss:$8 sps:$4 sm:$0xff]  }
  0x1d   :  { %674 = vmatpush1.bf16.msra.mxu0 %v1324_v1  ;;  %v1330_v5 = vld [vmem:[%s1928_s1 + $0x60] ss:$8 sps:$4 sm:$0xff]   ;;  %714 = vmatprep.subr.bf16.mxu1 %v1325_v2  ;;  %v1331_v6 = vld [vmem:[%s1928_s1 + $0x164] ss:$8 sps:$4 sm:$0xff]   ;;  %v1334_v8 = vld [vmem:[%s1928_s1 + $0x54] ss:$8 sps:$4 sm:$0xff]  }
  0x1e   :  { %715 = vmatpush1.bf16.msra.mxu1 %v1327_v3  ;;  %675 = vmatprep.subr.bf16.mxu0 %v1328_v4  ;;  %v1333_v7 = vld [vmem:[%s1928_s1 + $0x160] ss:$8 sps:$4 sm:$0xff]   ;;  %v1336_v9 = vld [vmem:[%s1928_s1 + $0x50] ss:$8 sps:$4 sm:$0xff]   ;;  %v1337_v10 = vld [vmem:[%s1928_s1 + $0x154] ss:$8 sps:$4 sm:$0xff]  }
  0x1f   :  { %716 = vmatprep.subr.bf16.mxu1 %v1331_v6  ;;  %v1340_v11 = vld [vmem:[%s1928_s1 + $0x44] ss:$8 sps:$4 sm:$0xff]   ;;  %v1339_v12 = vld [vmem:[%s1928_s1 + $0x150] ss:$8 sps:$4 sm:$0xff]   ;;  %v1342_v14 = vld [vmem:[%s1928_s1 + $0x40] ss:$8 sps:$4 sm:$0xff]  }
  0x20   :  { %v1343_v13 = vld [vmem:[%s1928_s1 + $0x144] ss:$8 sps:$4 sm:$0xff]   ;;  %v1346_v15 = vld [vmem:[%s1928_s1 + $0x34] ss:$8 sps:$4 sm:$0xff]   ;;  %v1345_v16 = vld [vmem:[%s1928_s1 + $0x140] ss:$8 sps:$4 sm:$0xff]  }
  0x21   :  { %676 = vmatpush1.bf16.msra.mxu0 %v1330_v5  ;;  %v1349_v17 = vld [vmem:[%s1928_s1 + $0x134] ss:$8 sps:$4 sm:$0xff]   ;;  %v1348_v18 = vld [vmem:[%s1928_s1 + $0x30] ss:$8 sps:$4 sm:$0xff]   ;;  %v1352_v19 = vld [vmem:[%s1928_s1 + $0x24] ss:$8 sps:$4 sm:$0xff]  }
  0x22   :  { %677 = vmatprep.subr.bf16.mxu0 %v1334_v8  ;;  %717 = vmatpush1.bf16.msra.mxu1 %v1333_v7  ;;  %v1351_v20 = vld [vmem:[%s1928_s1 + $0x130] ss:$8 sps:$4 sm:$0xff]   ;;  %v1355_v21 = vld [vmem:[%s1928_s1 + $0x124] ss:$8 sps:$4 sm:$0xff]   ;;  %v1354_v22 = vld [vmem:[%s1928_s1 + $0x20] ss:$8 sps:$4 sm:$0xff]  }
  0x23   :  { %718 = vmatprep.subr.bf16.mxu1 %v1337_v10  ;;  %v1358_v23 = vld [vmem:[%s1928_s1 + $0x14] ss:$8 sps:$4 sm:$0xff]   ;;  %v1357_v24 = vld [vmem:[%s1928_s1 + $0x120] ss:$8 sps:$4 sm:$0xff]   ;;  %v1360_v26 = vld [vmem:[%s1928_s1 + $0x10] ss:$8 sps:$4 sm:$0xff]  }
  0x24   :  { %v1361_v25 = vld [vmem:[%s1928_s1 + $0x114] ss:$8 sps:$4 sm:$0xff]   ;;  %v1364_v27 = vld [vmem:[%s1928_s1 + $0x4] ss:$8 sps:$4 sm:$0xff]   ;;  %v1363_v28 = vld [vmem:[%s1928_s1 + $0x110] ss:$8 sps:$4 sm:$0xff]  }
  0x25   :  { %678 = vmatpush1.bf16.msra.mxu0 %v1336_v9  ;;  %v1367_v29 = vld [vmem:[%s1928_s1 + $0x104] ss:$8 sps:$4 sm:$0xff]   ;;  %v1366_v30 = vld [vmem:[%s1928_s1] ss:$8 sps:$4 sm:$0xff]   ;;  %v1370_v31 = vld [vmem:[%s1928_s1 + $0xf4] ss:$8 sps:$4 sm:$0xff]  }
  0x26   :  { %679 = vmatprep.subr.bf16.mxu0 %v1340_v11  ;;  %719 = vmatpush1.bf16.msra.mxu1 %v1339_v12  ;;  %v1369_v32 = vld [vmem:[%s1928_s1 + $0x100] ss:$8 sps:$4 sm:$0xff]   ;;  %v1373_v33 = vld [vmem:[%s1928_s1 + $0x1f4] ss:$8 sps:$4 sm:$0xff]   ;;  %v1372_v34 = vld [vmem:[%s1928_s1 + $0xf0] ss:$8 sps:$4 sm:$0xff]  }
  0x27   :  { %720 = vmatprep.subr.bf16.mxu1 %v1343_v13  ;;  %v1376_v35 = vld [vmem:[%s1928_s1 + $0xe4] ss:$8 sps:$4 sm:$0xff]   ;;  %v1375_v36 = vld [vmem:[%s1928_s1 + $0x1f0] ss:$8 sps:$4 sm:$0xff]   ;;  %v1378_v38 = vld [vmem:[%s1928_s1 + $0xe0] ss:$8 sps:$4 sm:$0xff]  }
  0x28   :  { %v1379_v37 = vld [vmem:[%s1928_s1 + $0x1e4] ss:$8 sps:$4 sm:$0xff]   ;;  %v1382_v39 = vld [vmem:[%s1928_s1 + $0xd4] ss:$8 sps:$4 sm:$0xff]   ;;  %v1381_v40 = vld [vmem:[%s1928_s1 + $0x1e0] ss:$8 sps:$4 sm:$0xff]  }
  0x29   :  { %680 = vmatpush1.bf16.msra.mxu0 %v1342_v14  ;;  %v1385_v41 = vld [vmem:[%s1928_s1 + $0x1d4] ss:$8 sps:$4 sm:$0xff]   ;;  %v1384_v42 = vld [vmem:[%s1928_s1 + $0xd0] ss:$8 sps:$4 sm:$0xff]   ;;  %v1388_v43 = vld [vmem:[%s1928_s1 + $0xc4] ss:$8 sps:$4 sm:$0xff]  }
  0x2a   :  { %681 = vmatprep.subr.bf16.mxu0 %v1346_v15  ;;  %721 = vmatpush1.bf16.msra.mxu1 %v1345_v16  ;;  %v1387_v44 = vld [vmem:[%s1928_s1 + $0x1d0] ss:$8 sps:$4 sm:$0xff]   ;;  %v1391_v45 = vld [vmem:[%s1928_s1 + $0x1c4] ss:$8 sps:$4 sm:$0xff]   ;;  %v1390_v47 = vld [vmem:[%s1928_s1 + $0xc0] ss:$8 sps:$4 sm:$0xff]  }
  0x2b   :  { %722 = vmatprep.subr.bf16.mxu1 %v1349_v17  ;;  %v56_v46 = vld [vmem:[%s1927_s0 + $0x8] sm:$0xff]  ;;  %v1394_v49 = vld [vmem:[%s1928_s1 + $0xb4] ss:$8 sps:$4 sm:$0xff]   ;;  %v1396_v54 = vld [vmem:[%s1928_s1 + $0xb0] ss:$8 sps:$4 sm:$0xff]   ;;  %vm669_vm0 = vcmask 130048  }
  0x2c   :  { %v63_v48 = vpack.c.bf16 %v56_v46, %v56_v46  ;;  %v58_v50 = vld [vmem:[%s1927_s0 + $0x18] sm:$0xff]  ;;  %v1393_v51 = vld [vmem:[%s1928_s1 + $0x1c0] ss:$8 sps:$4 sm:$0xff]   ;;  %v1400_v55 = vld [vmem:[%s1928_s1 + $0xa4] ss:$8 sps:$4 sm:$0xff]   ;;  %vm1543_vm1 = vmmov 0  }
  0x2d   :  { %682 = vmatpush1.bf16.msra.mxu0 %v1348_v18  ;;  %v65_v52 = vpack.c.bf16 %v58_v50, %v58_v50  ;;  %v1397_v53 = vld [vmem:[%s1928_s1 + $0x1b4] ss:$8 sps:$4 sm:$0xff]   ;;  %v1399_v56 = vld [vmem:[%s1928_s1 + $0x1b0] ss:$8 sps:$4 sm:$0xff]   ;;  %v1403_v57 = vld [vmem:[%s1928_s1 + $0x1a4] ss:$8 sps:$4 sm:$0xff]  }
  0x2e   :  { %683 = vmatprep.subr.bf16.mxu0 %v1352_v19  ;;  %723 = vmatpush1.bf16.msra.mxu1 %v1351_v20  ;;  %v1402_v58 = vld [vmem:[%s1928_s1 + $0xa0] ss:$8 sps:$4 sm:$0xff]   ;;  %v1406_v59 = vld [vmem:[%s1928_s1 + $0x94] ss:$8 sps:$4 sm:$0xff]   ;;  %v1408_v62 = vld [vmem:[%s1928_s1 + $0x90] ss:$8 sps:$4 sm:$0xff]  }
  0x2f   :  { %724 = vmatprep.subr.bf16.mxu1 %v1355_v21  ;;  %705 = vmatprep.mubr.bf16.mxu0 %v63_v48  ;;  %v1405_v60 = vld [vmem:[%s1928_s1 + $0x1a0] ss:$8 sps:$4 sm:$0xff]   ;;  %v1409_v61 = vld [vmem:[%s1928_s1 + $0x194] ss:$8 sps:$4 sm:$0xff]   ;;  %v1412_v63 = vld [vmem:[%s1928_s1 + $0x84] ss:$8 sps:$4 sm:$0xff]  }
  0x30   :  { %746 = vmatprep.mubr.bf16.mxu1 %v65_v52  ;;  %v1411_v0 = vld [vmem:[%s1928_s1 + $0x190] ss:$8 sps:$4 sm:$0xff]   ;;  %v1414_v1 = vld [vmem:[%s1928_s1 + $0x80] ss:$8 sps:$4 sm:$0xff]   ;;  %v1415_v2 = vld [vmem:[%s1928_s1 + $0x184] ss:$8 sps:$4 sm:$0xff]  }
  0x31   :  { %684 = vmatpush1.bf16.msra.mxu0 %v1354_v22  ;;  %v1417_v3 = vld [vmem:[%s1928_s1 + $0x180] ss:$8 sps:$4 sm:$0xff]   ;;  %v1420_v5 = vld [vmem:[%s1928_s1 + $0x274] ss:$8 sps:$4 sm:$0xff]   ;;  %v1418_v8 = vld [vmem:[%s1928_s1 + $0x270] ss:$8 sps:$4 sm:$0xff]  }
  0x32   :  { %685 = vmatprep.subr.bf16.mxu0 %v1358_v23  ;;  %725 = vmatpush1.bf16.msra.mxu1 %v1357_v24  ;;  %v55_v4 = vld [vmem:[%s1927_s0] sm:$0xff]  ;;  %v57_v6 = vld [vmem:[%s1927_s0 + $0x10] sm:$0xff]  ;;  %v60_v16 = vld [vmem:[%s1927_s0 + $0x28] sm:$0xff]  ;;  %v1541_v19 = vmov 0  }
  0x33   :  { %726 = vmatprep.subr.bf16.mxu1 %v1361_v25  ;;  %v62_v7 = vpack.c.bf16 %v55_v4, %v55_v4  ;;  %v1423_v9 = vld [vmem:[%s1928_s1 + $0x264] ss:$8 sps:$4 sm:$0xff]   ;;  %v64_v10 = vpack.c.bf16 %v57_v6, %v57_v6  ;;  %v1463_v11 = vld [vmem:[%s1928_s1 + $0x300] ss:$8 sps:$4 sm:$0xff]   ;;  %v1426_v14 = vld [vmem:[%s1928_s1 + $0x254] ss:$8 sps:$4 sm:$0xff]   ;;  %v67_v17 = vpack.c.bf16 %v60_v16, %v60_v16 }
  0x34   :  { %v1465_v12 = vld [vmem:[%s1928_s1 + $0x304] ss:$8 sps:$4 sm:$0xff]   ;;  %v1421_v13 = vld [vmem:[%s1928_s1 + $0x260] ss:$8 sps:$4 sm:$0xff]   ;;  %v61_v15 = vld [vmem:[%s1927_s0 + $0x30] sm:$0xff] }
  0x35   :  { %686 = vmatpush1.bf16.msra.mxu0 %v1360_v26  ;;  %v1424_v18 = vld [vmem:[%s1928_s1 + $0x250] ss:$8 sps:$4 sm:$0xff]   ;;  %v1429_v20 = vld [vmem:[%s1928_s1 + $0x244] ss:$8 sps:$4 sm:$0xff]   ;;  %v68_v21 = vpack.c.bf16 %v61_v15, %v61_v15  ;;  %v1427_v22 = vld [vmem:[%s1928_s1 + $0x240] ss:$8 sps:$4 sm:$0xff]  }
  0x36   :  { %687 = vmatprep.subr.bf16.mxu0 %v1364_v27  ;;  %727 = vmatpush1.bf16.msra.mxu1 %v1363_v28  ;;  %v1432_v23 = vld [vmem:[%s1928_s1 + $0x234] ss:$8 sps:$4 sm:$0xff]   ;;  %v1430_v24 = vld [vmem:[%s1928_s1 + $0x230] ss:$8 sps:$4 sm:$0xff]   ;;  %v1435_v25 = vld [vmem:[%s1928_s1 + $0x224] ss:$8 sps:$4 sm:$0xff]  }
  0x37   :  { %728 = vmatprep.subr.bf16.mxu1 %v1367_v29  ;;  %v1433_v26 = vld [vmem:[%s1928_s1 + $0x220] ss:$8 sps:$4 sm:$0xff]   ;;  %v1438_v27 = vld [vmem:[%s1928_s1 + $0x214] ss:$8 sps:$4 sm:$0xff]   ;;  %v1436_v28 = vld [vmem:[%s1928_s1 + $0x210] ss:$8 sps:$4 sm:$0xff]  }
  0x38   :  { %v1441_v29 = vld [vmem:[%s1928_s1 + $0x204] ss:$8 sps:$4 sm:$0xff]   ;;  %v1466_v46 = vld [vmem:[%s1928_s1 + $0x280] ss:$8 sps:$4 sm:$0xff]   ;;  %v1470_v50 = vld [vmem:[#allocation2 + $0x38] sm:$0xff]  }
  0x39   :  { %688 = vmatpush1.bf16.msra.mxu0 %v1366_v30  ;;  %v1439_v30 = vld [vmem:[%s1928_s1 + $0x200] ss:$8 sps:$4 sm:$0xff]   ;;  %v1472_v52 = vld [vmem:[#allocation2 + $0x30] sm:$0xff]  }
  0x3a   :  { %689 = vmatprep.subr.bf16.mxu0 %v1370_v31  ;;  %729 = vmatpush1.bf16.msra.mxu1 %v1369_v32  ;;  %v1444_v31 = vld [vmem:[%s1928_s1 + $0x2f4] ss:$8 sps:$4 sm:$0xff]   ;;  %v1442_v32 = vld [vmem:[%s1928_s1 + $0x2f0] ss:$8 sps:$4 sm:$0xff]  }
  0x3b   :  { %730 = vmatprep.subr.bf16.mxu1 %v1373_v33  ;;  %v1447_v33 = vld [vmem:[%s1928_s1 + $0x2e4] ss:$8 sps:$4 sm:$0xff]  }
  0x3d   :  { %690 = vmatpush2.bf16.msra.mxu0 %v1372_v34  ;;  %v1445_v34 = vld [vmem:[%s1928_s1 + $0x2e0] ss:$8 sps:$4 sm:$0xff]  }
  0x3e   :  { %691 = vmatprep.subr.bf16.mxu0 %v1376_v35  ;;  %731 = vmatpush2.bf16.msra.mxu1 %v1375_v36  ;;  %v1450_v35 = vld [vmem:[%s1928_s1 + $0x2d4] ss:$8 sps:$4 sm:$0xff]   ;;  %v1448_v36 = vld [vmem:[%s1928_s1 + $0x2d0] ss:$8 sps:$4 sm:$0xff]  }
  0x3f   :  { %732 = vmatprep.subr.bf16.mxu1 %v1379_v37  ;;  %v1453_v37 = vld [vmem:[%s1928_s1 + $0x2c4] ss:$8 sps:$4 sm:$0xff]  }
  0x41   :  { %692 = vmatpush2.bf16.msra.mxu0 %v1378_v38  ;;  %v1451_v38 = vld [vmem:[%s1928_s1 + $0x2c0] ss:$8 sps:$4 sm:$0xff]  }
  0x42   :  { %693 = vmatprep.subr.bf16.mxu0 %v1382_v39  ;;  %733 = vmatpush2.bf16.msra.mxu1 %v1381_v40  ;;  %v1456_v39 = vld [vmem:[%s1928_s1 + $0x2b4] ss:$8 sps:$4 sm:$0xff]   ;;  %v1454_v40 = vld [vmem:[%s1928_s1 + $0x2b0] ss:$8 sps:$4 sm:$0xff]  }
  0x43   :  { %734 = vmatprep.subr.bf16.mxu1 %v1385_v41  ;;  %v1459_v41 = vld [vmem:[%s1928_s1 + $0x2a4] ss:$8 sps:$4 sm:$0xff]  }
  0x45   :  { %694 = vmatpush2.bf16.msra.mxu0 %v1384_v42  ;;  %v1457_v42 = vld [vmem:[%s1928_s1 + $0x2a0] ss:$8 sps:$4 sm:$0xff]  }
  0x46   :  { %695 = vmatprep.subr.bf16.mxu0 %v1388_v43  ;;  %735 = vmatpush2.bf16.msra.mxu1 %v1387_v44  ;;  %v1462_v43 = vld [vmem:[%s1928_s1 + $0x294] ss:$8 sps:$4 sm:$0xff]   ;;  %v1460_v44 = vld [vmem:[%s1928_s1 + $0x290] ss:$8 sps:$4 sm:$0xff]  }
  0x47   :  { %736 = vmatprep.subr.bf16.mxu1 %v1391_v45  ;;  %v1468_v45 = vld [vmem:[%s1928_s1 + $0x284] ss:$8 sps:$4 sm:$0xff]  }
  0x49   :  { %696 = vmatpush2.bf16.msra.mxu0 %v1390_v47  ;;  %v59_v47 = vld [vmem:[%s1927_s0 + $0x20] sm:$0xff] }
  0x4a   :  { %697 = vmatprep.subr.bf16.mxu0 %v1394_v49  ;;  %737 = vmatpush2.bf16.msra.mxu1 %v1393_v51  ;;  %v66_v48 = vpack.c.bf16 %v59_v47, %v59_v47  ;;  %v1469_v49 = vld [vmem:[#allocation2 + $0x78] sm:$0xff]   ;;  %v1471_v51 = vld [vmem:[#allocation2 + $0x70] sm:$0xff]  }
  0x4b   :  { %738 = vmatprep.subr.bf16.mxu1 %v1397_v53  ;;  %v1473_v53 = vld [vmem:[#allocation2 + $0x68] sm:$0xff]  }
  0x4d   :  { %698 = vmatpush2.bf16.msra.mxu0 %v1396_v54  ;;  %v1474_v54 = vld [vmem:[#allocation2 + $0x28] sm:$0xff]  }
  0x4e   :  { %699 = vmatprep.subr.bf16.mxu0 %v1400_v55  ;;  %739 = vmatpush2.bf16.msra.mxu1 %v1399_v56  ;;  %v1475_v55 = vld [vmem:[#allocation2 + $0x60] sm:$0xff]  }
  0x4f   :  { %740 = vmatprep.subr.bf16.mxu1 %v1403_v57  ;;  %v1476_v56 = vld [vmem:[#allocation2 + $0x20] sm:$0xff]   ;;  %v1477_v57 = vld [vmem:[#allocation2 + $0x58] sm:$0xff]  }
  0x51   :  { %700 = vmatpush2.bf16.msra.mxu0 %v1402_v58  ;;  %v1478_v58 = vld [vmem:[#allocation2 + $0x18] sm:$0xff]  }
  0x52   :  { %701 = vmatprep.subr.bf16.mxu0 %v1406_v59  ;;  %741 = vmatpush2.bf16.msra.mxu1 %v1405_v60  ;;  %v1479_v59 = vld [vmem:[#allocation2 + $0x50] sm:$0xff]  }
  0x53   :  { %742 = vmatprep.subr.bf16.mxu1 %v1409_v61  ;;  %v1480_v60 = vld [vmem:[#allocation2 + $0x10] sm:$0xff]   ;;  %v1481_v61 = vld [vmem:[#allocation2 + $0x48] sm:$0xff]  }
  0x55   :  { %702 = vmatpush2.bf16.msra.mxu0 %v1408_v62  ;;  %v1482_v62 = vld [vmem:[#allocation2 + $0x8] sm:$0xff]  }
  0x56   :  { %703 = vmatprep.subr.bf16.mxu0 %v1412_v63  ;;  %743 = vmatpush2.bf16.msra.mxu1 %v1411_v0  ;;  %v1483_v63 = vld [vmem:[#allocation2 + $0x40] sm:$0xff]  }
  0x57   :  { %744 = vmatprep.subr.bf16.mxu1 %v1415_v2  ;;  %v1484_v0 = vld [vmem:[#allocation2] sm:$0xff]  }
  0x59   :  { %704 = vmatpush2.bf16.msra.mxu0 %v1414_v1  ;;  %v1542_v1 = vmov 0.0  }
  0x5a   :  { %755 = vmatprep.subr.bf16.mxu0 %v1420_v5  ;;  %745 = vmatpush2.bf16.msra.mxu1 %v1417_v3 }
  0x5b   :  { %810 = vmatprep.subr.bf16.mxu1 %v1465_v12 }
  0x5c   :  { %706 = vmatmul.mubr.bf16.vlgmr.msra.gmra.mxu0 %v62_v7 }
  0x5d   :  { %756 = vmatpush1.bf16.msra.mxu0 %v1418_v8  ;;  %747 = vmatmul.mubr.bf16.vlgmr.msra.gmra.mxu1 %v64_v10 }
  0x5e   :  { %757 = vmatprep.subr.bf16.mxu0 %v1423_v9  ;;  %811 = vmatpush1.bf16.msra.mxu1 %v1463_v11 }
  0x5f   :  { %828 = vmatprep.mubr.bf16.mxu1 %v1541_v19  ;;  %787 = vmatprep.mubr.bf16.mxu0 %v67_v17  ;;  %v167_v17 = vld [vmem:[%s1929_s2] sm:$0x3] }
  0x60   :  { %1264 = vmatprep.subr.bf16.mxu1 %v1469_v49 }
  0x61   :  { %758 = vmatpush1.bf16.msra.mxu0 %v1421_v13 }
  0x62   :  { %759 = vmatprep.subr.bf16.mxu0 %v1426_v14  ;;  %v169_v14 = vlaneseq }
  0x64   :  { %v170_v15 = vshrl.u32 %v169_v14, 7 }
  0x65   :  { %760 = vmatpush1.bf16.msra.mxu0 %v1424_v18  ;;  %1237 = vmatmul.mubr.msk.bf16.vlgmr.msra.gmra.mxu1 %vm669_vm0, %v68_v21 }
  0x66   :  { %761 = vmatprep.subr.bf16.mxu0 %v1429_v20  ;;  %1265 = vmatpush3.bf16.msra.mxu1 %v1470_v50  ;;  %v171_v16 = vsub.s32 0, %v170_v15  ;;  %v175_v18 = vsub.s32 1, %v170_v15 }
  0x67   :  { %1266 = vmatprep.subr.bf16.mxu1 %v1471_v51 }
  0x68   :  { %v172_v19 = vrot.slane %v167_v17, %v171_v16  ;;  %v176_v20 = vrot.slane %v167_v17, %v175_v18 }
  0x69   :  { %762 = vmatpush1.bf16.msra.mxu0 %v1427_v22 }
  0x6a   :  { %763 = vmatprep.subr.bf16.mxu0 %v1432_v23  ;;  %1267 = vmatpush3.bf16.msra.mxu1 %v1472_v52 }
  0x6b   :  { %1268 = vmatprep.subr.bf16.mxu1 %v1473_v53 }
  0x6d   :  { %764 = vmatpush1.bf16.msra.mxu0 %v1430_v24 }
  0x6e   :  { %765 = vmatprep.subr.bf16.mxu0 %v1435_v25  ;;  %1269 = vmatpush3.bf16.msra.mxu1 %v1474_v54 }
  0x6f   :  { %1270 = vmatprep.subr.bf16.mxu1 %v1475_v55  ;;  %v1255_v55 = vld [vmem:[%s1933_s6] ss:$0 sm:$0xff] }
  0x71   :  { %766 = vmatpush1.bf16.msra.mxu0 %v1433_v26 }
  0x72   :  { %767 = vmatprep.subr.bf16.mxu0 %v1438_v27  ;;  %1271 = vmatpush3.bf16.msra.mxu1 %v1476_v56 }
  0x73   :  { %1272 = vmatprep.subr.bf16.mxu1 %v1477_v57 }
  0x75   :  { %768 = vmatpush1.bf16.msra.mxu0 %v1436_v28 }
  0x76   :  { %769 = vmatprep.subr.bf16.mxu0 %v1441_v29  ;;  %1273 = vmatpush3.bf16.msra.mxu1 %v1478_v58 }
  0x77   :  { %1274 = vmatprep.subr.bf16.mxu1 %v1479_v59 }
  0x79   :  { %770 = vmatpush1.bf16.msra.mxu0 %v1439_v30 }
  0x7a   :  { %771 = vmatprep.subr.bf16.mxu0 %v1444_v31  ;;  %1275 = vmatpush3.bf16.msra.mxu1 %v1480_v60 }
  0x7b   :  { %1276 = vmatprep.subr.bf16.mxu1 %v1481_v61 }
  0x7d   :  { %772 = vmatpush2.bf16.msra.mxu0 %v1442_v32 }
  0x7e   :  { %773 = vmatprep.subr.bf16.mxu0 %v1447_v33  ;;  %1277 = vmatpush3.bf16.msra.mxu1 %v1482_v62 }
  0x7f   :  { %1278 = vmatprep.subr.bf16.mxu1 %v1483_v63 }
  0x81   :  { %774 = vmatpush2.bf16.msra.mxu0 %v1445_v34 }
  0x82   :  { %775 = vmatprep.subr.bf16.mxu0 %v1450_v35  ;;  %1279 = vmatpush3.bf16.msra.mxu1 %v1484_v0 }
  0x83   :  { %1295 = vmatprep.subr.bf16.mxu1 %v1542_v1 }
  0x85   :  { %776 = vmatpush2.bf16.msra.mxu0 %v1448_v36  ;;  %v1485_v36 = vld [vmem:[#allocation4 + $0x38] sm:$0xff]  }
  0x86   :  { %777 = vmatprep.subr.bf16.mxu0 %v1453_v37 }
  0x89   :  { %778 = vmatpush2.bf16.msra.mxu0 %v1451_v38  ;;  %v1486_v38 = vld [vmem:[#allocation4 + $0x30] sm:$0xff]  }
  0x8a   :  { %779 = vmatprep.subr.bf16.mxu0 %v1456_v39  ;;  %v1487_v39 = vld [vmem:[#allocation4 + $0x28] sm:$0xff]  }
  0x8d   :  { %780 = vmatpush2.bf16.msra.mxu0 %v1454_v40  ;;  %v1488_v40 = vld [vmem:[#allocation4 + $0x20] sm:$0xff]  }
  0x8e   :  { %781 = vmatprep.subr.bf16.mxu0 %v1459_v41  ;;  %v1489_v41 = vld [vmem:[#allocation4 + $0x18] sm:$0xff]  }
  0x91   :  { %782 = vmatpush2.bf16.msra.mxu0 %v1457_v42  ;;  %v1490_v42 = vld [vmem:[#allocation4 + $0x10] sm:$0xff]  }
  0x92   :  { %783 = vmatprep.subr.bf16.mxu0 %v1462_v43  ;;  %v1491_v43 = vld [vmem:[#allocation4 + $0x8] sm:$0xff]  }
  0x95   :  { %784 = vmatpush2.bf16.msra.mxu0 %v1460_v44  ;;  %v1492_v44 = vld [vmem:[#allocation4] sm:$0xff]  }
  0x96   :  { %785 = vmatprep.subr.bf16.mxu0 %v1468_v45 }
  0x99   :  { %786 = vmatpush2.bf16.msra.mxu0 %v1466_v46  ;;  %v1238_v46 = vld [vmem:[%s1931_s4] ss:$0 sm:$0xff] }
  0x9c   :  { %788 = vmatmul.mubr.bf16.vlgmr.msra.gmra.mxu0 %v66_v48 }
 0x11c   :  { %v707_v2 = vpop.f32.mrf.mxu0 }
 0x11d   :  { %v748_v4 = vpop.f32.mrf.mxu1  ;;  %v708_v21 = vadd.f32 %v707_v2, %v172_v19 }
 0x11e   :  { %v709_v3 = vpop.f32.mrf.mxu0 }
 0x11f   :  { %v750_v6 = vpop.f32.mrf.mxu1  ;;  %v710_v22 = vadd.f32 %v709_v3, %v176_v20  ;;  %v749_v23 = vadd.f32 %v748_v4, %v708_v21 }
 0x120   :  { %v711_v5 = vpop.f32.mrf.mxu0 }
 0x121   :  { %v752_v8 = vpop.f32.mrf.mxu1  ;;  %v751_v25 = vadd.f32 %v750_v6, %v710_v22 }
 0x122   :  { %v712_v7 = vpop.f32.mrf.mxu0 }
 0x123   :  { %v753_v9 = vpop.f32.mrf.mxu1 }
 0x125   :  { %v830_v10 = vpop.f32.mrf.mxu1 }
 0x127   :  { %v832_v11 = vpop.f32.mrf.mxu1 }
 0x129   :  { %v834_v12 = vpop.f32.mrf.mxu1 }
 0x12b   :  { %v835_v13 = vpop.f32.mrf.mxu1 }
 0x15c   :  { %v789_v24 = vpop.f32.mrf.mxu0 }
 0x15d   :  { %v790_v26 = vadd.f32 %v789_v24, %v749_v23 }
 0x15e   :  { %v791_v27 = vpop.f32.mrf.mxu0 }
 0x15f   :  { %v831_v28 = vadd.f32 %v830_v10, %v790_v26  ;;  %v792_v29 = vadd.f32 %v791_v27, %v751_v25 }
 0x160   :  { %v793_v30 = vpop.f32.mrf.mxu0 }
 0x161   :  { %v833_v31 = vadd.f32 %v832_v11, %v792_v29  ;;  %v837_v32 = vmax.f32 %v831_v28, 0.0 }
 0x162   :  { %v794_v33 = vpop.f32.mrf.mxu0 }
 0x163   :  { %v838_v34 = vmax.f32 %v833_v31, 0.0  ;;  %v839_v37 = vpack.c.bf16 %v837_v32, %v837_v32 }
 0x165   :  { %v840_v35 = vpack.c.bf16 %v838_v34, %v838_v34 }
 0x167   :  { %1008 = vmatprep.mubr.bf16.mxu1 %v840_v35 }
 0x168   :  { %1009 = vmatmul.mubr.bf16.vlgmr.msra.gmra.mxu1 %v839_v37 }
 0x169   :  { %1296 = vmatpush3.bf16.msra.mxu1 %v1485_v36  ;;  %1311 = vmatprep.mubr.msk.bf16.mxu1 %vm1543_vm1, %v1542_v1 }
 0x16a   :  { %1297 = vmatprep.subr.bf16.mxu1 %v1542_v1 }
 0x16d   :  { %1298 = vmatpush3.bf16.msra.mxu1 %v1486_v38 }
 0x16e   :  { %1299 = vmatprep.subr.bf16.mxu1 %v1542_v1 }
 0x171   :  { %1300 = vmatpush3.bf16.msra.mxu1 %v1487_v39 }
 0x172   :  { %1301 = vmatprep.subr.bf16.mxu1 %v1542_v1 }
 0x175   :  { %1302 = vmatpush3.bf16.msra.mxu1 %v1488_v40 }
 0x176   :  { %1303 = vmatprep.subr.bf16.mxu1 %v1542_v1 }
 0x179   :  { %1304 = vmatpush3.bf16.msra.mxu1 %v1489_v41 }
 0x17a   :  { %1305 = vmatprep.subr.bf16.mxu1 %v1542_v1 }
 0x17d   :  { %1306 = vmatpush3.bf16.msra.mxu1 %v1490_v42 }
 0x17e   :  { %1307 = vmatprep.subr.bf16.mxu1 %v1542_v1 }
 0x181   :  { %1308 = vmatpush3.bf16.msra.mxu1 %v1491_v43 }
 0x182   :  { %1309 = vmatprep.subr.bf16.mxu1 %v1542_v1 }
 0x185   :  { %1310 = vmatpush3.bf16.msra.mxu1 %v1492_v44 }
 0x228   :  { %v1280_v45 = vpop.f32.mrf.mxu1 }
 0x22a   :  { %v1281_v47 = vpop.f32.mrf.mxu1 }
 0x22b   :  { %v1282_v48 = vadd.f32 %v1281_v47, %v1280_v45 }
 0x22c   :  { %v1283_v49 = vpop.f32.mrf.mxu1 }
 0x22d   :  { %v1011_v50 = vadd.f32 %v1282_v48, %v1238_v46 }
 0x22e   :  { %v1284_v51 = vpop.f32.mrf.mxu1 }
 0x22f   :  { %vm1016_vm2 = vcmp.gt.f32.partialorder %v1011_v50, 0.0  ;;  %v1017_v52 = vmul.f32 0.01, %v1011_v50 }
 0x231   :  { %v1018_v53 = vsel %vm1016_vm2, %v1011_v50, %v1017_v52 }
 0x232   :  { %v1019_v54 = vpack.c.bf16 %v1018_v53, %v1018_v53 }
 0x234   :  { %1312 = vmatmul.mubr.bf16.vlgmr.msra.gmra.mxu1 %v1019_v54 }
 0x2f4   :  { %v1125_v56 = vpop.f32.mrf.mxu1 }
 0x2f5   :  { %v1126_v57 = vadd.f32 %v1255_v55, %v1125_v56 }
 0x2f6   :  { %v1313_v58 = vpop.f32.mrf.mxu1 }
 0x2f7   :  { %v1131_v59 = vpack.c.bf16 %v1126_v57, %v1126_v57 }
 0x2f8   :  { %v1128_v60 = vpop.f32.mrf.mxu1 }
 0x2f9   :  { %1132 = vst [vmem:[%s1934_s7] sm:$0xf] %v1131_v59 }
 0x2fa   :  { %v1314_v61 = vpop.f32.mrf.mxu1 }
 0x2fb   :  { %1137 = vsyncpa [#allocation3], 1 }
 0x2fc   :  { %1138 = vsyncpa [#allocation5], 1 }

</bundles_post_ra>
